<compile_context>
chip_gen: v7x
topology: tpu7x:2x2x1
jax: 0.10.0
libtpu: 0.0.40
codegen_flags: <defaults>
</compile_context>

<pallas_src>
import functools

import jax
import jax.numpy as jnp
import numpy as np
from jax.experimental import pallas as pl
from jax.experimental.pallas import tpu as pltpu

LANES = 128
MAX_TILE_R = 8192             # 8192 rows * 128 lanes * 4 B = 4 MiB per f32 input block
VMEM_LIMIT_BYTES = 48 << 20   # 2 inputs * 2 pipeline bufs * 4 MiB + whole-block temporaries


def _round_up(x, m):
    return (x + m - 1) // m * m


def _choose_tile_r(rows):
    if rows <= 8:
        return rows  # block == full array extent -> always a legal BlockSpec
    # At least 2 blocks (megacore sharding on v7x) and at most MAX_TILE_R rows
    # per block (VMEM budget); multiple of 8 for the (8,128) tiling rule.
    return min(MAX_TILE_R, _round_up(pl.cdiv(rows, 2), 8))


def _dice_partial_kernel(x_ref, t_ref, out_ref, *, tile_r, rows, needs_mask):
    """Per-block lane-dense partials: (1,3,128) = [sum(sig*t); sum(sig); sum(t)]."""
    x = x_ref[...].astype(jnp.float32)
    t = t_ref[...].astype(jnp.float32)
    sig = jax.nn.sigmoid(x)

    def write_partials(sig_v, t_v):
        inter = jnp.sum(sig_v * t_v, axis=0, keepdims=True)   # (1,128)
        psum = jnp.sum(sig_v, axis=0, keepdims=True)
        tsum = jnp.sum(t_v, axis=0, keepdims=True)
        out_ref[0] = jnp.concatenate([inter, psum, tsum], axis=0)

    if not needs_mask:
        write_partials(sig, t)
    else:
        i = pl.program_id(0)
        last = pl.num_programs(0) - 1

        @pl.when(i != last)
        def _():
            # Fast path: fully-valid blocks pay zero masking cost.
            write_partials(sig, t)

        @pl.when(i == last)
        def _():
            # Only the last block over-reads (rows % tile_r != 0).  Row-index
            # mask (no flat 32-bit element index -> no int32 overflow) and the
            # select happens before the multiply/sums so undefined VMEM
            # contents (NaN/Inf) cannot leak into the reductions.
            row_ids = jax.lax.broadcasted_iota(jnp.int32, (tile_r, LANES), 0)
            valid = (i * tile_r + row_ids) < rows
            write_partials(jnp.where(valid, sig, 0.0),
                           jnp.where(valid, t, 0.0))


def complex_dice_loss(inputs, targets, *, smooth=1.0):
    """Dice loss matching ComplexDiceLoss.forward (post-magnitude real inputs).

    Inputs/targets may be any float dtype (bf16 logits recommended -- the
    kernel is HBM-bound and casts to f32 under the DMA inside the kernel).
    """
    assert inputs.shape == targets.shape
    n_elems = int(np.prod(inputs.shape))

    x = inputs.reshape(-1)   # free reshape; keep original dtype
    t = targets.reshape(-1)

    rows = n_elems // LANES
    n_body = rows * LANES
    rem = n_elems - n_body

    intersection = jnp.float32(0.0)
    inputs_sum = jnp.float32(0.0)
    targets_sum = jnp.float32(0.0)

    if rows > 0:
        # TODO(synk): when rem != 0 XLA materializes this prefix slice before
        # the custom call (same O(N) copy the old jnp.pad had); avoiding it
        # entirely would need a manual-DMA (pl.ANY) path.  rem == 0 is the
        # common case and is zero-copy.
        x2 = (x if rem == 0 else x[:n_body]).reshape(rows, LANES)
        t2 = (t if rem == 0 else t[:n_body]).reshape(rows, LANES)

        tile_r = _choose_tile_r(rows)
        num_blocks = pl.cdiv(rows, tile_r)
        needs_mask = (rows % tile_r) != 0   # only the last block is ragged

        kernel = functools.partial(_dice_partial_kernel, tile_r=tile_r,
                                   rows=rows, needs_mask=needs_mask)

        in_spec = pl.BlockSpec((tile_r, LANES), lambda i: (i, 0))
        out_spec = pl.BlockSpec((1, 3, LANES), lambda i: (i, 0, 0))

        partials = pl.pallas_call(
            kernel,
            out_shape=jax.ShapeDtypeStruct((num_blocks, 3, LANES), jnp.float32),
            grid_spec=pltpu.PrefetchScalarGridSpec(
                num_scalar_prefetch=0,
                grid=(num_blocks,),
                in_specs=[in_spec, in_spec],
                out_specs=out_spec,
            ),
            compiler_params=pltpu.CompilerParams(
                dimension_semantics=("parallel",),
                vmem_limit_bytes=VMEM_LIMIT_BYTES),
        )(x2, t2)

        sums = jnp.sum(partials, axis=(0, 2))   # (3,) tiny follow-up reduce in f32
        intersection = sums[0]
        inputs_sum = sums[1]
        targets_sum = sums[2]

    if rem:
        # <=127-element ragged tail handled with plain jnp (O(128) work).
        tail_p = jax.nn.sigmoid(x[n_body:].astype(jnp.float32))
        tail_t = t[n_body:].astype(jnp.float32)
        intersection = intersection + jnp.sum(tail_p * tail_t)
        inputs_sum = inputs_sum + jnp.sum(tail_p)
        targets_sum = targets_sum + jnp.sum(tail_t)

    smooth = jnp.float32(smooth)
    dice = (2.0 * intersection + smooth) / (inputs_sum + targets_sum + smooth)
    return 1.0 - dice


def _reference(inputs, targets, smooth=1.0):
    p = jax.nn.sigmoid(inputs.astype(jnp.float32)).reshape(-1)
    t = targets.astype(jnp.float32).reshape(-1)
    intersection = jnp.sum(p * t)
    dice = (2.0 * intersection + smooth) / (jnp.sum(p) + jnp.sum(t) + smooth)
    return 1.0 - dice


if __name__ == "__main__":
    key = jax.random.PRNGKey(0)

    # NCHW-shaped logits/targets, as the torch module would receive.
    test_shapes = [
        (2, 4, 16, 16),   # 2048 elems: rows=16 -> 2 blocks, no mask, no tail
        (1, 5, 9, 128),   # 5760 elems: rows=45 -> ragged last block (mask path)
        (2, 3, 11, 7),    # 462 elems: rows=3 full-extent block + 78-elem tail
    ]

    for idx, shape in enumerate(test_shapes):
        k1, k2 = jax.random.split(jax.random.fold_in(key, idx))
        inputs = jax.random.normal(k1, shape, dtype=jnp.float32)
        targets = jax.random.bernoulli(k2, p=0.5, shape=shape).astype(jnp.float32)

        loss = jax.block_until_ready(complex_dice_loss(inputs, targets, smooth=1.0))
        ref = _reference(inputs, targets, smooth=1.0)
        np.testing.assert_allclose(np.asarray(loss), np.asarray(ref),
                                   rtol=1e-5, atol=1e-6)

    print("KERNEL_OK")
</pallas_src>

<mosaic_0001>
module attributes {stable_mosaic.version = 11 : i64} {
  func.func @_dice_partial_kernel(%arg0: i32, %arg1: memref<8x128xf32, #tpu.memory_space<vmem>>, %arg2: memref<8x128xf32, #tpu.memory_space<vmem>>, %arg3: memref<1x3x128xf32, #tpu.memory_space<vmem>>) attributes {dimension_semantics = [#tpu.dimension_semantics<parallel>], iteration_bounds = array<i64: 2>, scalar_prefetch = 0 : i64, scratch_operands = 0 : i64, tpu.core_type = #tpu.core_type<tc>, window_params = [{transform_indices = @transform_0, window_bounds = array<i64: 8, 128>}, {transform_indices = @transform_1, window_bounds = array<i64: 8, 128>}, {transform_indices = @transform_2, window_bounds = array<i64: 1, 3, 128>}]} {
    %c0 = arith.constant 0 : index
    %c0_0 = arith.constant 0 : index
    %0 = vector.load %arg1[%c0, %c0_0] : memref<8x128xf32, #tpu.memory_space<vmem>>, vector<8x128xf32>
    %c0_1 = arith.constant 0 : index
    %c0_2 = arith.constant 0 : index
    %1 = vector.load %arg2[%c0_1, %c0_2] : memref<8x128xf32, #tpu.memory_space<vmem>>, vector<8x128xf32>
    %2 = arith.negf %0 : vector<8x128xf32>
    %3 = math.exp %2 : vector<8x128xf32>
    %cst = arith.constant 1.000000e+00 : f32
    %4 = vector.broadcast %cst : f32 to vector<8x128xf32>
    %5 = arith.addf %4, %3 : vector<8x128xf32>
    %6 = arith.divf %4, %5 : vector<8x128xf32>
    %7 = arith.mulf %6, %1 : vector<8x128xf32>
    %cst_3 = arith.constant dense<0.000000e+00> : vector<128xf32>
    %8 = vector.multi_reduction <add>, %7, %cst_3 [0] : vector<8x128xf32> to vector<128xf32>
    %9 = vector.shape_cast %8 : vector<128xf32> to vector<1x128xf32>
    %cst_4 = arith.constant dense<0.000000e+00> : vector<128xf32>
    %10 = vector.multi_reduction <add>, %6, %cst_4 [0] : vector<8x128xf32> to vector<128xf32>
    %11 = vector.shape_cast %10 : vector<128xf32> to vector<1x128xf32>
    %cst_5 = arith.constant dense<0.000000e+00> : vector<128xf32>
    %12 = vector.multi_reduction <add>, %1, %cst_5 [0] : vector<8x128xf32> to vector<128xf32>
    %13 = vector.shape_cast %12 : vector<128xf32> to vector<1x128xf32>
    %14 = tpu.concatenate %9, %11, %13 in 0 : vector<1x128xf32>, vector<1x128xf32>, vector<1x128xf32> -> vector<3x128xf32>
    %c0_6 = arith.constant 0 : index
    %c0_7 = arith.constant 0 : index
    %c0_8 = arith.constant 0 : index
    %15 = vector.load %arg3[%c0_6, %c0_7, %c0_8] : memref<1x3x128xf32, #tpu.memory_space<vmem>>, vector<1x3x128xf32>
    %16 = vector.shape_cast %15 : vector<1x3x128xf32> to vector<3x128xf32>
    %17 = vector.shape_cast %14 : vector<3x128xf32> to vector<1x3x128xf32>
    tpu.vector_store %arg3[%c0_6, %c0_7, %c0_8], %17 {strides = array<i32>} : memref<1x3x128xf32, #tpu.memory_space<vmem>>, vector<1x3x128xf32>,
    return
  }
  func.func @transform_0(%arg0: i32) -> (i32, i32) {
    %c0_i32 = arith.constant 0 : i32
    %c0_i32_0 = arith.constant 0 : i32
    return %arg0, %c0_i32 : i32, i32
  }
  func.func @transform_1(%arg0: i32) -> (i32, i32) {
    %c0_i32 = arith.constant 0 : i32
    %c0_i32_0 = arith.constant 0 : i32
    return %arg0, %c0_i32 : i32, i32
  }
  func.func @transform_2(%arg0: i32) -> (i32, i32, i32) {
    %c0_i32 = arith.constant 0 : i32
    %c0_i32_0 = arith.constant 0 : i32
    %c0_i32_1 = arith.constant 0 : i32
    return %arg0, %c0_i32, %c0_i32_0 : i32, i32, i32
  }
}

</mosaic_0001>

<bundles_post_ra>
// kernel: tpu_custom_call.1
= control target key start
LH: loop header
LB: loop body
LE: loop exit
PB: predicated region body
PF: predicated region fallthrough
CT: control target
= control target key end

     0   :  { %7 = vsyncpa [#allocation3], 0  ;;  %s649_s0 = inlined_call_operand.hbm [shape: f32[16,128], index: 0, kind: input, shape index: {}]   ;;  %s650_s1 = inlined_call_operand.hbm [shape: f32[16,128], index: 1, kind: input, shape index: {}]   ;;  %s651_s2 = inlined_call_operand.vmem [shape: f32[2,3,128], index: 2, kind: output, shape index: {}]  }
   0x1   :  { %9 = vsyncpa [#allocation3 + $0x1], 0 }
   0x2   :  { %10 = vsyncpa [#allocation5], 0 }
   0x3   :  { %12 = vsyncpa [#allocation5 + $0x1], 0  ;;  %s495_s9 = smov 0   ;;  %s497_s10 = smov 0  }
   0x4   :  { %s499_s11 = smov 0   ;;  %s501_s12 = smov 0  }
   0x5 LB: > { %s514_s13 = sadd.s32 4294967295, %s476_s12   ;;  %s517_s14 = sadd.s32 1, %s476_s12   ;;  %s476_s12 = sphi %s501_s12, %s663_s12   ;;  %s472_s11 = sphi %s499_s11, %s662_s11   ;;  %s468_s10 = sphi %s497_s10, %s661_s10   ;;  %s464_s9 = sphi %s495_s9, %s660_s9  }
   0x6   : > { %s22_s15 = ssub.s32 %s476_s12, %s517_s14  ;;  %s25_s16 = sadd.s32 1, %s472_s11 }
   0x7   : > { %p23_p0 = scmp.eq.s32.totalorder %s22_s15, 0  ;;  %p32_p1 = scmp.ne.s32.totalorder %s472_s11, %s468_s10 }
   0x8   : > { %p33_p2 = scmp.eq.s32.totalorder %s476_s12, 0  ;;  %p38_p3 = scmp.ne.s32.totalorder %s468_s10, %s464_s9 }
   0x9   : > { %s527_s17 = scalar_select %p23_p0, %s472_s11, %s25_s16  }
   0xa   : > { %p34_p4 = por %p33_p2, %p32_p1  ;;  %p39_p5 = scmp.eq.s32.totalorder %s514_s13, 0 }
   0xb   : > { %p341_p6 = scmp.lt.s32.totalorder %s476_s12, 2  ;;  %s536_s19 = sand.u32 1, %s472_s11  }
   0xc   : > { %p531_p7 = por %p39_p5, %p38_p3  ;;  %s319_s20 = sshll.u32 %s536_s19, 3 }
   0xd   : > { %s320_s21 = sshll.u32 %s476_s12, 7  ;;  %s118_s25 = scalar_lea.vmem [#allocation2], %s319_s20 }
   0xe   : > { %s653_s18 = scalar_select %p531_p7, 1, 0 }
   0xf   : > { %s545_s24 = scalar_lea.hbm %s649_s0, %s320_s21  ;;  %s125_s26 = sshll.u32 %s118_s25, 4  ;;  %s549_s26 = int_to_ptr.vmem [resolvable:$true] %s125_s26 }
  0x10   : > { %p551_p8 = pnand %p341_p6, %p34_p4  ;;  %s115_s28 = scalar_lea.sflag [#allocation3], %s536_s19 }
  0x11   : > { %s378_s29 = scalar_lea.hbm %s545_s24, 128  ;;  %s383_s4 = scalar_lea.hbm %s649_s0, 256 }
  0x12   : > { %p379_p11 = scmp.ne.s32.totalorder %s545_s24, %s378_s29  ;;  %p380_p12 = pneg %p551_p8 }
  0x13   : > { %p384_p1 = scmp.lt.u32.totalorder %s545_s24, %s649_s0  ;;  %p385_p2 = scmp.lt.u32.totalorder %s383_s4, %s378_s29 }
  0x14   : > { %p381_p13 = pnand %p380_p12, %p379_p11  ;;  %p387_p4 = scmp.lt.u32.totalorder %s378_s29, %s545_s24 }
  0x15   : > { %p386_p3 = por %p385_p2, %p384_p1 }
  0x16   : > { %p382_p0 = pneg %p381_p13 }
  0x17   : > { %p388_p5 = por %p387_p4, %p386_p3 }
  0x19   : > { %p389_p6 = pnand %p388_p5, %p382_p0 }
  0x1b   : > { %392 = shalt.err (!%p389_p6)
}
  0x1c   : > { %s393_s7 = scalar_lea.vmem %s549_s26, 128  ;;  %s478_s8 = smov [#allocation2]  }
  0x1d   : > { %p394_p11 = scmp.ne.s32.totalorder %s549_s26, %s393_s7  ;;  %s398_s9 = sshll.u32 %s478_s8, 4  ;;  %s399_s9 = int_to_ptr.vmem [resolvable:$false] %s398_s9 }
  0x1e   : > { %s400_s15 = scalar_lea.vmem %s399_s9, 256  ;;  %p401_p10 = scmp.lt.s32.totalorder %s549_s26, %s399_s9 }
  0x1f   : > { %p396_p13 = pnand %p394_p11, %p380_p12  ;;  %p402_p1 = scmp.lt.s32.totalorder %s400_s15, %s393_s7 }
  0x21   : > { %p397_p9 = pneg %p396_p13  ;;  %p403_p2 = por %p402_p1, %p401_p10 }
  0x23   : > { %p404_p3 = pnand %p403_p2, %p397_p9 }
  0x25   : > { %407 = shalt.err (!%p404_p3)
}
  0x26   : > { %337 = dma.hbm_to_vmem [thread:$0]  (!%p551_p8), %s545_s24, 128, %s549_s26, %s115_s28  }
  0x27   : > { %p655_p0 = scmp.lt.s32.totalorder %s476_s12, 3  ;;  %p656_p4 = scmp.ge.s32.totalorder %s476_s12, 1 }
  0x28   : > { %s596_s25 = scalar_lea.hbm %s650_s1, %s320_s21  ;;  %s136_s29 = scalar_lea.vmem [#allocation4], %s319_s20 }
  0x29   : > { %p587_p5 = pnand %p656_p4, %p655_p0  ;;  %s143_s30 = sshll.u32 %s136_s29, 4  ;;  %s144_s30 = int_to_ptr.vmem [resolvable:$true] %s143_s30 }
  0x2a   : > { %s133_s24 = scalar_lea.sflag [#allocation5], %s536_s19  ;;  %s408_s26 = scalar_lea.hbm %s596_s25, 128 }
  0x2b   : > { %s657_s16 = scalar_select %p587_p5, 1, 0 }
  0x2c   : > { %p409_p9 = scmp.ne.s32.totalorder %s596_s25, %s408_s26  ;;  %s413_s21 = scalar_lea.hbm %s650_s1, 256 }
  0x2d   : > { %p414_p11 = scmp.lt.u32.totalorder %s596_s25, %s650_s1  ;;  %p415_p13 = scmp.lt.u32.totalorder %s413_s21, %s408_s26 }
  0x2e   : > { %p411_p10 = pnand %p409_p9, %p380_p12  ;;  %p417_p2 = scmp.lt.u32.totalorder %s408_s26, %s596_s25 }
  0x2f   : > { %p416_p1 = por %p415_p13, %p414_p11 }
  0x30   : > { %p412_p6 = pneg %p411_p10 }
  0x31   : > { %p418_p3 = por %p417_p2, %p416_p1 }
  0x33   : > { %p419_p0 = pnand %p418_p3, %p412_p6 }
  0x35   : > { %422 = shalt.err (!%p419_p0)
}
  0x36   : > { %s423_s19 = scalar_lea.vmem %s144_s30, 128  ;;  %s479_s20 = smov [#allocation4]  }
  0x37   : > { %p424_p4 = scmp.ne.s32.totalorder %s144_s30, %s423_s19  ;;  %s428_s5 = sshll.u32 %s479_s20, 4  ;;  %s429_s5 = int_to_ptr.vmem [resolvable:$false] %s428_s5 }
  0x38   : > { %s430_s6 = scalar_lea.vmem %s429_s5, 256  ;;  %p431_p7 = scmp.lt.s32.totalorder %s144_s30, %s429_s5 }
  0x39   : > { %p426_p9 = pnand %p424_p4, %p380_p12  ;;  %p432_p5 = scmp.lt.s32.totalorder %s430_s6, %s423_s19 }
  0x3b   : > { %p427_p10 = pneg %p426_p9  ;;  %p433_p11 = por %p432_p5, %p431_p7 }
  0x3d   : > { %p434_p13 = pnand %p433_p11, %p427_p10 }
  0x3f   : > { %437 = shalt.err (!%p434_p13)
}
  0x40   : > { %340 = dma.hbm_to_vmem [thread:$0]  (!%p551_p8), %s596_s25, 128, %s144_s30, %s133_s24  }
  0x41   : > { %p658_p6 = scmp.ne.s32.totalorder %s657_s16, 0 }
  0x42   : > { %s154_s7 = sand.u32 (!%p658_p6), 1, %s468_s10   ;;  %p659_p12 = scmp.ne.s32.totalorder (!%p658_p6), %s653_s18, 0 }
  0x43   : > { %152 = sbr.rel (%p658_p6) target bundleno = 121 (0x79), region = 28  ;;  %s324_s8 = sshll.u32 (!%p658_p6), %s154_s7, 3 }
  0x44   : > { %s155_s9 = scalar_lea.sflag (!%p658_p6), [#allocation3], %s154_s7  ;;  %s158_s15 = scalar_lea.vmem (!%p658_p6), [#allocation2], %s324_s8 }
  0x4a   : > { %455 = dma.done.wait (%p659_p12), %s155_s9, 128  }
  0x4b   : > { %457 = vsyncadd (%p659_p12), %s155_s9, 4294967168  ;;  %s164_s22 = scalar_lea.sflag [#allocation5], %s154_s7  ;;  %s167_s23 = scalar_lea.vmem [#allocation4], %s324_s8 }
  0x4c   : > { %459 = dma.done.wait (%p659_p12), %s164_s22, 128  }
  0x4d   : > { %461 = vsyncadd (%p659_p12), %s164_s22, 4294967168  ;;  %v196_v0 = vld [vmem:[%s158_s15] sm:$0xff]  ;;  %v197_v4 = vld [vmem:[%s167_s23] sm:$0xff]  ;;  %p192_p7 = scmp.lt.s32.totalorder %s514_s13, 1  ;;  %vm223_vm0 = vcmask 1040384   ;;  %vm225_vm1 = vcmask 1041408  }
  0x4e   : > { %v327_v1 = vmul.f32 -1.442695, %v196_v0  ;;  %v217_v5 = vrot.slane %v197_v4, 4 }
  0x4f   : > { %s665_s13 = smov (!%p192_p7, %s514_s13), 1 }
  0x50   : > { %374 = vpow2.f32 %v327_v1  ;;  %v218_v6 = vadd.f32 %v217_v5, %v197_v4  ;;  %s326_s18 = sshll.u32 %s665_s13, 2 }
  0x51   : > { %s195_s25 = scalar_lea.vmem %s651_s2, %s326_s18 }
  0x52   : > { %v219_v8 = vrot.slane %v218_v6, 2 }
  0x54   : > { %v220_v13 = vadd.f32 %v219_v8, %v218_v6 }
  0x56   : > { %v221_v18 = vrot.slane %v220_v13, 1 }
  0x58   : > { %v222_v23 = vadd.f32 %v221_v18, %v220_v13 }
  0x5a   : > { %v375_v2 = vpop.eup %374 }
  0x5b   : > { %v201_v3 = vadd.f32 1.0, %v375_v2 }
  0x5d   : > { %376 = vrcp.f32 %v201_v3 }
  0x67   : > { %v377_v7 = vpop.eup %376 }
  0x68   : > { %v204_v9 = vmul.f32 %v377_v7, %v197_v4  ;;  %v211_v10 = vrot.slane %v377_v7, 4 }
  0x6a   : > { %v205_v11 = vrot.slane %v204_v9, 4  ;;  %v212_v12 = vadd.f32 %v377_v7, %v211_v10 }
  0x6c   : > { %v206_v14 = vadd.f32 %v205_v11, %v204_v9  ;;  %v213_v15 = vrot.slane %v212_v12, 2 }
  0x6e   : > { %v207_v16 = vrot.slane %v206_v14, 2  ;;  %v214_v17 = vadd.f32 %v213_v15, %v212_v12 }
  0x70   : > { %v208_v19 = vadd.f32 %v207_v16, %v206_v14  ;;  %v215_v20 = vrot.slane %v214_v17, 1 }
  0x72   : > { %v209_v21 = vrot.slane %v208_v19, 1  ;;  %v216_v22 = vadd.f32 %v215_v20, %v214_v17 }
  0x74   : > { %v210_v24 = vadd.f32 %v209_v21, %v208_v19 }
  0x76   : > { %v224_v25 = vsel %vm223_vm0, %v210_v24, %v216_v22 }
  0x77   : > { %v226_v26 = vsel %vm225_vm1, %v224_v25, %v222_v23 }
  0x78   : > { %227 = vst [vmem:[%s195_s25] sm:$0x7] %v226_v26 }
  0x79 PF: > { %p15_p8 = scmp.ge.s32.totalorder %s517_s14, 4   ;;  %s660_s9 = smov %s468_s10 }
  0x7a   : > { %s661_s10 = smov %s472_s11  ;;  %s662_s11 = smov %s527_s17 }
  0x7b   : > { %s663_s12 = smov %s517_s14  ;;  %17 = sbr.rel (!%p15_p8) target bundleno = 5 (0x5), region = 81 }
  0x82   :  { %247 = vsyncpa [#allocation3], 1 }
  0x83   :  { %249 = vsyncpa [#allocation3 + $0x1], 1 }
  0x84   :  { %250 = vsyncpa [#allocation5], 1 }
  0x85   :  { %252 = vsyncpa [#allocation5 + $0x1], 1 }

</bundles_post_ra>
